<compile_context>
chip_gen: v6e
topology: v6e:2x2x1
jax: 0.10.0
libtpu: 0.0.40
codegen_flags: <defaults>
</compile_context>

<pallas_src>
import functools
import math

import jax
import jax.numpy as jnp
from jax import lax
from jax.experimental import pallas as pl
from jax.experimental.pallas import tpu as pltpu

_MASK_VALUE = -1e30  # finite, exp() underflows to exactly 0.0 in f32


def _mha_kernel(q_ref, k_ref, v_ref,
                wq_ref, bq_ref, wk_ref, bk_ref, wv_ref, bv_ref,
                wo_ref, bo_ref,
                out_ref, scores_ref,
                acc_ref,
                *, q_tile, scale, masked):
    h = pl.program_id(2)
    num_heads = pl.num_programs(2)

    xq = q_ref[0]            # (tq, E)
    xk = k_ref[0]            # (S,  E)
    xv = v_ref[0]            # (S,  E)

    wq = wq_ref[0]           # (E, D)  head-h slice of WQ
    wk = wk_ref[0]           # (E, D)
    wv = wv_ref[0]           # (E, D)
    wo = wo_ref[0]           # (D, E)  head-h row-block of WO

    # Per-head projections: deep contraction over E, f32 accumulation.
    Qh = jnp.dot(xq, wq, preferred_element_type=jnp.float32) + bq_ref[0]   # (tq, D)
    Kh = jnp.dot(xk, wk, preferred_element_type=jnp.float32) + bk_ref[0]   # (S,  D)
    Vh = jnp.dot(xv, wv, preferred_element_type=jnp.float32) + bv_ref[0]   # (S,  D)

    # scores = Qh @ Kh^T without materializing a transpose: contract D of both.
    s = lax.dot_general(Qh, Kh,
                        dimension_numbers=(((1,), (1,)), ((), ())),
                        preferred_element_type=jnp.float32) * scale        # (tq, S)

    if masked:
        q0 = pl.program_id(1) * q_tile
        rows = q0 + lax.broadcasted_iota(jnp.int32, s.shape, 0)
        cols = lax.broadcasted_iota(jnp.int32, s.shape, 1)
        s = jnp.where(cols > rows, jnp.float32(_MASK_VALUE), s)

    # Numerically stable softmax; reciprocal goes to the EUP (free slot).
    m = jnp.max(s, axis=-1, keepdims=True)
    e = jnp.exp(s - m)
    denom = jnp.sum(e, axis=-1, keepdims=True)
    p = e * pl.reciprocal(denom, approx=False)

    scores_ref[0, 0] = p.astype(scores_ref.dtype)                          # (tq, S)

    # Attention output for this head, then its partial output projection.
    o_h = jnp.dot(p, Vh, preferred_element_type=jnp.float32)               # (tq, D)
    contrib = jnp.dot(o_h, wo, preferred_element_type=jnp.float32)         # (tq, E)

    @pl.when(h == 0)
    def _():
        acc_ref[...] = jnp.zeros_like(acc_ref)

    acc_ref[...] += contrib

    @pl.when(h == num_heads - 1)
    def _():
        out_ref[0] = (acc_ref[...] + bo_ref[...]).astype(out_ref.dtype)


def _pick_q_tile(seq_len):
    for t in (256, 128):
        if seq_len % t == 0:
            return t
    return seq_len  # block == full dim keeps the (8,128) rules satisfied


def multi_head_attention(q, k, v, params, num_heads, masked=False):
    """Pallas implementation of Multi_Head_Attention.forward.

    q, k, v: (B, S, E) float32.  params: dict with wq,bq,wk,bk,wv,bv,wo,bo
    where weights are (E, E) stored as (in, out) and biases are (1, E).
    Returns (output (B, S, E), attention_scores (B, H, S, S)).
    """
    B, Sq, E = q.shape
    _, Sk, _ = k.shape
    assert Sq == Sk, "Query and Key lengths must be equal for self-attention"
    assert k.shape == (B, Sk, E) and v.shape == (B, Sk, E)
    assert E % num_heads == 0
    D = E // num_heads

    # Host-side, one-time head-major re-layout of the parameters.
    wq_h = jnp.transpose(params["wq"].reshape(E, num_heads, D), (1, 0, 2))   # (H, E, D)
    wk_h = jnp.transpose(params["wk"].reshape(E, num_heads, D), (1, 0, 2))   # (H, E, D)
    wv_h = jnp.transpose(params["wv"].reshape(E, num_heads, D), (1, 0, 2))   # (H, E, D)
    wo_h = params["wo"].reshape(num_heads, D, E)                             # (H, D, E)
    bq_h = params["bq"].reshape(num_heads, 1, D)                             # (H, 1, D)
    bk_h = params["bk"].reshape(num_heads, 1, D)
    bv_h = params["bv"].reshape(num_heads, 1, D)
    bo = params["bo"]                                                        # (1, E)

    tq = _pick_q_tile(Sq)
    n_q = Sq // tq
    grid = (B, n_q, num_heads)

    kernel = functools.partial(_mha_kernel,
                               q_tile=tq,
                               scale=1.0 / math.sqrt(D),
                               masked=masked)

    q_spec = pl.BlockSpec((1, tq, E), lambda b, qi, h: (b, qi, 0))
    kv_spec = pl.BlockSpec((1, Sk, E), lambda b, qi, h: (b, 0, 0))
    wp_spec = pl.BlockSpec((1, E, D), lambda b, qi, h: (h, 0, 0))
    bp_spec = pl.BlockSpec((1, 1, D), lambda b, qi, h: (h, 0, 0))
    wo_spec = pl.BlockSpec((1, D, E), lambda b, qi, h: (h, 0, 0))
    bo_spec = pl.BlockSpec((1, E), lambda b, qi, h: (0, 0))
    out_spec = pl.BlockSpec((1, tq, E), lambda b, qi, h: (b, qi, 0))
    sc_spec = pl.BlockSpec((1, 1, tq, Sk), lambda b, qi, h: (b, h, qi, 0))

    out_shape = (jax.ShapeDtypeStruct((B, Sq, E), q.dtype),
                 jax.ShapeDtypeStruct((B, num_heads, Sq, Sk), jnp.float32))

    # Rough VMEM budget (double-buffered I/O blocks + in-kernel live values),
    # clamped so it is safe on every generation (<= 48 MiB << v7x's 64 MiB).
    f32 = 4
    io_blocks = (2 * tq * E + 2 * 2 * Sk * E + 2 * 3 * E * D + 2 * D * E
                 + 2 * tq * E + 2 * tq * Sk + tq * E)
    live = 3 * tq * Sk + tq * D + 2 * Sk * D + 2 * tq * E
    vmem_bytes = int(min(max(2 * f32 * (io_blocks + live), 16 * 1024 * 1024),
                         48 * 1024 * 1024))

    return pl.pallas_call(
        kernel,
        out_shape=out_shape,
        grid_spec=pltpu.PrefetchScalarGridSpec(
            num_scalar_prefetch=0,
            grid=grid,
            in_specs=[q_spec, kv_spec, kv_spec,
                      wp_spec, bp_spec, wp_spec, bp_spec,
                      wp_spec, bp_spec, wo_spec, bo_spec],
            out_specs=[out_spec, sc_spec],
            scratch_shapes=[pltpu.VMEM((tq, E), jnp.float32)]),
        compiler_params=pltpu.CompilerParams(
            dimension_semantics=("parallel", "parallel", "arbitrary"),
            vmem_limit_bytes=vmem_bytes),
    )(q, k, v,
      wq_h, bq_h, wk_h, bk_h, wv_h, bv_h, wo_h, bo)


def _reference(q, k, v, params, num_heads, masked=False):
    """Pure-JAX reference mirroring the PyTorch module."""
    B, S, E = q.shape
    D = E // num_heads

    def lin(x, w, b):
        return x @ w + b  # w is (in, out), b is (1, E)

    Q = lin(q, params["wq"], params["bq"]).reshape(B, S, num_heads, D).transpose(0, 2, 1, 3)
    K = lin(k, params["wk"], params["bk"]).reshape(B, S, num_heads, D).transpose(0, 2, 1, 3)
    V = lin(v, params["wv"], params["bv"]).reshape(B, S, num_heads, D).transpose(0, 2, 1, 3)

    scores = jnp.einsum("bhqd,bhkd->bhqk", Q, K) / math.sqrt(D)
    if masked:
        mask = jnp.triu(jnp.ones((S, S), dtype=bool), k=1)[None, None]
        scores = jnp.where(mask, -jnp.inf, scores)
    attn = jax.nn.softmax(scores, axis=-1)
    out = jnp.einsum("bhqk,bhkd->bhqd", attn, V)
    out = out.transpose(0, 2, 1, 3).reshape(B, S, E)
    out = lin(out, params["wo"], params["bo"])
    return out, attn


if __name__ == "__main__":
    # Small, module-consistent shapes: batch=2, seq=8, embed_dim=32, heads=4.
    B, S, E, H = 2, 8, 32, 4

    key = jax.random.PRNGKey(0)
    keys = jax.random.split(key, 12)
    q = jax.random.normal(keys[0], (B, S, E), dtype=jnp.float32)
    k = jax.random.normal(keys[1], (B, S, E), dtype=jnp.float32)
    v = jax.random.normal(keys[2], (B, S, E), dtype=jnp.float32)

    def init_linear(kw, kb):
        bound = 1.0 / math.sqrt(E)
        w = jax.random.uniform(kw, (E, E), minval=-bound, maxval=bound, dtype=jnp.float32)
        b = jax.random.uniform(kb, (1, E), minval=-bound, maxval=bound, dtype=jnp.float32)
        return w, b

    wq, bq = init_linear(keys[3], keys[4])
    wk, bk = init_linear(keys[5], keys[6])
    wv, bv = init_linear(keys[7], keys[8])
    wo, bo = init_linear(keys[9], keys[10])
    params = dict(wq=wq, bq=bq, wk=wk, bk=bk, wv=wv, bv=bv, wo=wo, bo=bo)

    ok = True
    for masked in (False, True):
        out, attn = multi_head_attention(q, k, v, params, H, masked=masked)
        out = jax.block_until_ready(out)
        attn = jax.block_until_ready(attn)

        out_ref, attn_ref = _reference(q, k, v, params, H, masked=masked)
        ok &= bool(jnp.allclose(out, out_ref, atol=1e-4, rtol=1e-4))
        ok &= bool(jnp.allclose(attn, attn_ref, atol=2e-5, rtol=1e-4))

    if ok:
        print("KERNEL_OK")
    else:
        print("KERNEL_MISMATCH")
</pallas_src>

<mosaic_0001>
module attributes {stable_mosaic.version = 11 : i64} {
  func.func @_mha_kernel(%arg0: i32, %arg1: i32, %arg2: i32, %arg3: memref<1x8x32xf32, #tpu.memory_space<vmem>>, %arg4: memref<1x8x32xf32, #tpu.memory_space<vmem>>, %arg5: memref<1x8x32xf32, #tpu.memory_space<vmem>>, %arg6: memref<1x32x8xf32, #tpu.memory_space<vmem>>, %arg7: memref<1x1x8xf32, #tpu.memory_space<vmem>>, %arg8: memref<1x32x8xf32, #tpu.memory_space<vmem>>, %arg9: memref<1x1x8xf32, #tpu.memory_space<vmem>>, %arg10: memref<1x32x8xf32, #tpu.memory_space<vmem>>, %arg11: memref<1x1x8xf32, #tpu.memory_space<vmem>>, %arg12: memref<1x8x32xf32, #tpu.memory_space<vmem>>, %arg13: memref<1x32xf32, #tpu.memory_space<vmem>>, %arg14: memref<1x8x32xf32, #tpu.memory_space<vmem>>, %arg15: memref<1x1x8x8xf32, #tpu.memory_space<vmem>>, %arg16: memref<8x32xf32, #tpu.memory_space<vmem>>) attributes {dimension_semantics = [#tpu.dimension_semantics<parallel>, #tpu.dimension_semantics<parallel>, #tpu.dimension_semantics<arbitrary>], iteration_bounds = array<i64: 2, 1, 4>, scalar_prefetch = 0 : i64, scratch_operands = 1 : i64, tpu.core_type = #tpu.core_type<tc>, window_params = [{transform_indices = @transform_0, window_bounds = array<i64: 1, 8, 32>}, {transform_indices = @transform_1, window_bounds = array<i64: 1, 8, 32>}, {transform_indices = @transform_2, window_bounds = array<i64: 1, 8, 32>}, {transform_indices = @transform_3, window_bounds = array<i64: 1, 32, 8>}, {transform_indices = @transform_4, window_bounds = array<i64: 1, 1, 8>}, {transform_indices = @transform_5, window_bounds = array<i64: 1, 32, 8>}, {transform_indices = @transform_6, window_bounds = array<i64: 1, 1, 8>}, {transform_indices = @transform_7, window_bounds = array<i64: 1, 32, 8>}, {transform_indices = @transform_8, window_bounds = array<i64: 1, 1, 8>}, {transform_indices = @transform_9, window_bounds = array<i64: 1, 8, 32>}, {pipeline_mode = #tpu.pipeline_mode<synchronous>, transform_indices = @transform_10, window_bounds = array<i64: 1, 32>}, {transform_indices = @transform_11, window_bounds = array<i64: 1, 8, 32>}, {transform_indices = @transform_12, window_bounds = array<i64: 1, 1, 8, 8>}]} {
    %c0 = arith.constant 0 : index
    %c0_0 = arith.constant 0 : index
    %c0_1 = arith.constant 0 : index
    %0 = vector.load %arg3[%c0, %c0_0, %c0_1] : memref<1x8x32xf32, #tpu.memory_space<vmem>>, vector<1x8x32xf32>
    %1 = vector.shape_cast %0 : vector<1x8x32xf32> to vector<8x32xf32>
    %c0_2 = arith.constant 0 : index
    %c0_3 = arith.constant 0 : index
    %c0_4 = arith.constant 0 : index
    %2 = vector.load %arg4[%c0_2, %c0_3, %c0_4] : memref<1x8x32xf32, #tpu.memory_space<vmem>>, vector<1x8x32xf32>
    %3 = vector.shape_cast %2 : vector<1x8x32xf32> to vector<8x32xf32>
    %c0_5 = arith.constant 0 : index
    %c0_6 = arith.constant 0 : index
    %c0_7 = arith.constant 0 : index
    %4 = vector.load %arg5[%c0_5, %c0_6, %c0_7] : memref<1x8x32xf32, #tpu.memory_space<vmem>>, vector<1x8x32xf32>
    %5 = vector.shape_cast %4 : vector<1x8x32xf32> to vector<8x32xf32>
    %c0_8 = arith.constant 0 : index
    %c0_9 = arith.constant 0 : index
    %c0_10 = arith.constant 0 : index
    %6 = vector.load %arg6[%c0_8, %c0_9, %c0_10] : memref<1x32x8xf32, #tpu.memory_space<vmem>>, vector<1x32x8xf32>
    %7 = vector.shape_cast %6 : vector<1x32x8xf32> to vector<32x8xf32>
    %c0_11 = arith.constant 0 : index
    %c0_12 = arith.constant 0 : index
    %c0_13 = arith.constant 0 : index
    %8 = vector.load %arg8[%c0_11, %c0_12, %c0_13] : memref<1x32x8xf32, #tpu.memory_space<vmem>>, vector<1x32x8xf32>
    %9 = vector.shape_cast %8 : vector<1x32x8xf32> to vector<32x8xf32>
    %c0_14 = arith.constant 0 : index
    %c0_15 = arith.constant 0 : index
    %c0_16 = arith.constant 0 : index
    %10 = vector.load %arg10[%c0_14, %c0_15, %c0_16] : memref<1x32x8xf32, #tpu.memory_space<vmem>>, vector<1x32x8xf32>
    %11 = vector.shape_cast %10 : vector<1x32x8xf32> to vector<32x8xf32>
    %c0_17 = arith.constant 0 : index
    %c0_18 = arith.constant 0 : index
    %c0_19 = arith.constant 0 : index
    %12 = vector.load %arg12[%c0_17, %c0_18, %c0_19] : memref<1x8x32xf32, #tpu.memory_space<vmem>>, vector<1x8x32xf32>
    %13 = vector.shape_cast %12 : vector<1x8x32xf32> to vector<8x32xf32>
    %cst = arith.constant dense<0.000000e+00> : vector<8x8xf32>
    %14 = tpu.matmul %1, %7, %cst {dimension_numbers = #tpu.dot_dimension_numbers<[1], [0], [0], [1], [0, 0, 1, 1], [], []>} : vector<8x32xf32>, vector<32x8xf32>, vector<8x8xf32> -> vector<8x8xf32>
    %c0_20 = arith.constant 0 : index
    %c0_21 = arith.constant 0 : index
    %c0_22 = arith.constant 0 : index
    %15 = vector.load %arg7[%c0_20, %c0_21, %c0_22] : memref<1x1x8xf32, #tpu.memory_space<vmem>>, vector<1x1x8xf32>
    %16 = vector.shape_cast %15 : vector<1x1x8xf32> to vector<1x8xf32>
    %17 = vector.broadcast %16 : vector<1x8xf32> to vector<8x8xf32>
    %18 = arith.addf %14, %17 : vector<8x8xf32>
    %cst_23 = arith.constant dense<0.000000e+00> : vector<8x8xf32>
    %19 = tpu.matmul %3, %9, %cst_23 {dimension_numbers = #tpu.dot_dimension_numbers<[1], [0], [0], [1], [0, 0, 1, 1], [], []>} : vector<8x32xf32>, vector<32x8xf32>, vector<8x8xf32> -> vector<8x8xf32>
    %c0_24 = arith.constant 0 : index
    %c0_25 = arith.constant 0 : index
    %c0_26 = arith.constant 0 : index
    %20 = vector.load %arg9[%c0_24, %c0_25, %c0_26] : memref<1x1x8xf32, #tpu.memory_space<vmem>>, vector<1x1x8xf32>
    %21 = vector.shape_cast %20 : vector<1x1x8xf32> to vector<1x8xf32>
    %22 = vector.broadcast %21 : vector<1x8xf32> to vector<8x8xf32>
    %23 = arith.addf %19, %22 : vector<8x8xf32>
    %cst_27 = arith.constant dense<0.000000e+00> : vector<8x8xf32>
    %24 = tpu.matmul %5, %11, %cst_27 {dimension_numbers = #tpu.dot_dimension_numbers<[1], [0], [0], [1], [0, 0, 1, 1], [], []>} : vector<8x32xf32>, vector<32x8xf32>, vector<8x8xf32> -> vector<8x8xf32>
    %c0_28 = arith.constant 0 : index
    %c0_29 = arith.constant 0 : index
    %c0_30 = arith.constant 0 : index
    %25 = vector.load %arg11[%c0_28, %c0_29, %c0_30] : memref<1x1x8xf32, #tpu.memory_space<vmem>>, vector<1x1x8xf32>
    %26 = vector.shape_cast %25 : vector<1x1x8xf32> to vector<1x8xf32>
    %27 = vector.broadcast %26 : vector<1x8xf32> to vector<8x8xf32>
    %28 = arith.addf %24, %27 : vector<8x8xf32>
    %cst_31 = arith.constant dense<0.000000e+00> : vector<8x8xf32>
    %29 = tpu.matmul %18, %23, %cst_31 {dimension_numbers = #tpu.dot_dimension_numbers<[1], [1], [0], [0], [0, 0, 1, 0], [], []>} : vector<8x8xf32>, vector<8x8xf32>, vector<8x8xf32> -> vector<8x8xf32>
    %cst_32 = arith.constant 0.353553385 : f32
    %30 = vector.broadcast %cst_32 : f32 to vector<8x8xf32>
    %31 = arith.mulf %29, %30 : vector<8x8xf32>
    %cst_33 = arith.constant dense<0xFF800000> : vector<8xf32>
    %32 = vector.multi_reduction <maximumf>, %31, %cst_33 [1] : vector<8x8xf32> to vector<8xf32>
    %33 = vector.shape_cast %32 : vector<8xf32> to vector<8x1xf32>
    %34 = vector.broadcast %33 : vector<8x1xf32> to vector<8x8xf32>
    %35 = arith.subf %31, %34 : vector<8x8xf32>
    %36 = math.exp %35 : vector<8x8xf32>
    %cst_34 = arith.constant dense<0.000000e+00> : vector<8xf32>
    %37 = vector.multi_reduction <add>, %36, %cst_34 [1] : vector<8x8xf32> to vector<8xf32>
    %38 = vector.shape_cast %37 : vector<8xf32> to vector<8x1xf32>
    %39 = tpu.reciprocal %38 : vector<8x1xf32> -> vector<8x1xf32>
    %40 = vector.broadcast %39 : vector<8x1xf32> to vector<8x8xf32>
    %41 = arith.mulf %36, %40 : vector<8x8xf32>
    %c0_35 = arith.constant 0 : index
    %c0_36 = arith.constant 0 : index
    %c0_37 = arith.constant 0 : index
    %c0_38 = arith.constant 0 : index
    %42 = vector.load %arg15[%c0_35, %c0_36, %c0_37, %c0_38] : memref<1x1x8x8xf32, #tpu.memory_space<vmem>>, vector<1x1x8x8xf32>
    %43 = vector.shape_cast %42 : vector<1x1x8x8xf32> to vector<8x8xf32>
    %44 = vector.shape_cast %41 : vector<8x8xf32> to vector<1x1x8x8xf32>
    tpu.vector_store %arg15[%c0_35, %c0_36, %c0_37, %c0_38], %44 {strides = array<i32>} : memref<1x1x8x8xf32, #tpu.memory_space<vmem>>, vector<1x1x8x8xf32>,
    %cst_39 = arith.constant dense<0.000000e+00> : vector<8x8xf32>
    %45 = tpu.matmul %41, %28, %cst_39 {dimension_numbers = #tpu.dot_dimension_numbers<[1], [0], [0], [1], [0, 0, 1, 1], [], []>} : vector<8x8xf32>, vector<8x8xf32>, vector<8x8xf32> -> vector<8x8xf32>
    %cst_40 = arith.constant dense<0.000000e+00> : vector<8x32xf32>
    %46 = tpu.matmul %45, %13, %cst_40 {dimension_numbers = #tpu.dot_dimension_numbers<[1], [0], [0], [1], [0, 0, 1, 1], [], []>} : vector<8x8xf32>, vector<8x32xf32>, vector<8x32xf32> -> vector<8x32xf32>
    %c0_i32 = arith.constant 0 : i32
    %47 = arith.cmpi eq, %arg2, %c0_i32 : i32
    %48 = arith.extui %47 : i1 to i32
    %c0_i32_41 = arith.constant 0 : i32
    %49 = arith.cmpi ne, %48, %c0_i32_41 : i32
    scf.if %49 {
      %cst_47 = arith.constant 0.000000e+00 : f32
      %56 = vector.broadcast %cst_47 : f32 to vector<8x32xf32>
      %c0_48 = arith.constant 0 : index
      %c0_49 = arith.constant 0 : index
      %57 = vector.load %arg16[%c0_48, %c0_49] : memref<8x32xf32, #tpu.memory_space<vmem>>, vector<8x32xf32>
      tpu.vector_store %arg16[%c0_48, %c0_49], %56 {strides = array<i32>} : memref<8x32xf32, #tpu.memory_space<vmem>>, vector<8x32xf32>,
    } else {
    }
    %c0_42 = arith.constant 0 : index
    %c0_43 = arith.constant 0 : index
    %50 = vector.load %arg16[%c0_42, %c0_43] : memref<8x32xf32, #tpu.memory_space<vmem>>, vector<8x32xf32>
    %51 = arith.addf %50, %46 : vector<8x32xf32>
    %c0_44 = arith.constant 0 : index
    %c0_45 = arith.constant 0 : index
    %52 = vector.load %arg16[%c0_44, %c0_45] : memref<8x32xf32, #tpu.memory_space<vmem>>, vector<8x32xf32>
    tpu.vector_store %arg16[%c0_44, %c0_45], %51 {strides = array<i32>} : memref<8x32xf32, #tpu.memory_space<vmem>>, vector<8x32xf32>,
    %c3_i32 = arith.constant 3 : i32
    %53 = arith.cmpi eq, %arg2, %c3_i32 : i32
    %54 = arith.extui %53 : i1 to i32
    %c0_i32_46 = arith.constant 0 : i32
    %55 = arith.cmpi ne, %54, %c0_i32_46 : i32
    scf.if %55 {
      %c0_47 = arith.constant 0 : index
      %c0_48 = arith.constant 0 : index
      %56 = vector.load %arg16[%c0_47, %c0_48] : memref<8x32xf32, #tpu.memory_space<vmem>>, vector<8x32xf32>
      %c0_49 = arith.constant 0 : index
      %c0_50 = arith.constant 0 : index
      %57 = vector.load %arg13[%c0_49, %c0_50] : memref<1x32xf32, #tpu.memory_space<vmem>>, vector<1x32xf32>
      %58 = vector.broadcast %57 : vector<1x32xf32> to vector<8x32xf32>
      %59 = arith.addf %56, %58 : vector<8x32xf32>
      %c0_51 = arith.constant 0 : index
      %c0_52 = arith.constant 0 : index
      %c0_53 = arith.constant 0 : index
      %60 = vector.load %arg14[%c0_51, %c0_52, %c0_53] : memref<1x8x32xf32, #tpu.memory_space<vmem>>, vector<1x8x32xf32>
      %61 = vector.shape_cast %60 : vector<1x8x32xf32> to vector<8x32xf32>
      %62 = vector.shape_cast %59 : vector<8x32xf32> to vector<1x8x32xf32>
      tpu.vector_store %arg14[%c0_51, %c0_52, %c0_53], %62 {strides = array<i32>} : memref<1x8x32xf32, #tpu.memory_space<vmem>>, vector<1x8x32xf32>,
    } else {
    }
    return
  }
  func.func @transform_0(%arg0: i32, %arg1: i32, %arg2: i32) -> (i32, i32, i32) {
    %c0_i32 = arith.constant 0 : i32
    %c0_i32_0 = arith.constant 0 : i32
    return %arg0, %arg1, %c0_i32 : i32, i32, i32
  }
  func.func @transform_1(%arg0: i32, %arg1: i32, %arg2: i32) -> (i32, i32, i32) {
    %c0_i32 = arith.constant 0 : i32
    %c0_i32_0 = arith.constant 0 : i32
    %c0_i32_1 = arith.constant 0 : i32
    return %arg0, %c0_i32, %c0_i32_0 : i32, i32, i32
  }
  func.func @transform_2(%arg0: i32, %arg1: i32, %arg2: i32) -> (i32, i32, i32) {
    %c0_i32 = arith.constant 0 : i32
    %c0_i32_0 = arith.constant 0 : i32
    %c0_i32_1 = arith.constant 0 : i32
    return %arg0, %c0_i32, %c0_i32_0 : i32, i32, i32
  }
  func.func @transform_3(%arg0: i32, %arg1: i32, %arg2: i32) -> (i32, i32, i32) {
    %c0_i32 = arith.constant 0 : i32
    %c0_i32_0 = arith.constant 0 : i32
    %c0_i32_1 = arith.constant 0 : i32
    return %arg2, %c0_i32, %c0_i32_0 : i32, i32, i32
  }
  func.func @transform_4(%arg0: i32, %arg1: i32, %arg2: i32) -> (i32, i32, i32) {
    %c0_i32 = arith.constant 0 : i32
    %c0_i32_0 = arith.constant 0 : i32
    %c0_i32_1 = arith.constant 0 : i32
    return %arg2, %c0_i32, %c0_i32_0 : i32, i32, i32
  }
  func.func @transform_5(%arg0: i32, %arg1: i32, %arg2: i32) -> (i32, i32, i32) {
    %c0_i32 = arith.constant 0 : i32
    %c0_i32_0 = arith.constant 0 : i32
    %c0_i32_1 = arith.constant 0 : i32
    return %arg2, %c0_i32, %c0_i32_0 : i32, i32, i32
  }
  func.func @transform_6(%arg0: i32, %arg1: i32, %arg2: i32) -> (i32, i32, i32) {
    %c0_i32 = arith.constant 0 : i32
    %c0_i32_0 = arith.constant 0 : i32
    %c0_i32_1 = arith.constant 0 : i32
    return %arg2, %c0_i32, %c0_i32_0 : i32, i32, i32
  }
  func.func @transform_7(%arg0: i32, %arg1: i32, %arg2: i32) -> (i32, i32, i32) {
    %c0_i32 = arith.constant 0 : i32
    %c0_i32_0 = arith.constant 0 : i32
    %c0_i32_1 = arith.constant 0 : i32
    return %arg2, %c0_i32, %c0_i32_0 : i32, i32, i32
  }
  func.func @transform_8(%arg0: i32, %arg1: i32, %arg2: i32) -> (i32, i32, i32) {
    %c0_i32 = arith.constant 0 : i32
    %c0_i32_0 = arith.constant 0 : i32
    %c0_i32_1 = arith.constant 0 : i32
    return %arg2, %c0_i32, %c0_i32_0 : i32, i32, i32
  }
  func.func @transform_9(%arg0: i32, %arg1: i32, %arg2: i32) -> (i32, i32, i32) {
    %c0_i32 = arith.constant 0 : i32
    %c0_i32_0 = arith.constant 0 : i32
    %c0_i32_1 = arith.constant 0 : i32
    return %arg2, %c0_i32, %c0_i32_0 : i32, i32, i32
  }
  func.func @transform_10(%arg0: i32, %arg1: i32, %arg2: i32) -> (i32, i32) {
    %c0_i32 = arith.constant 0 : i32
    %c0_i32_0 = arith.constant 0 : i32
    %c0_i32_1 = arith.constant 0 : i32
    return %c0_i32, %c0_i32_0 : i32, i32
  }
  func.func @transform_11(%arg0: i32, %arg1: i32, %arg2: i32) -> (i32, i32, i32) {
    %c0_i32 = arith.constant 0 : i32
    %c0_i32_0 = arith.constant 0 : i32
    return %arg0, %arg1, %c0_i32 : i32, i32, i32
  }
  func.func @transform_12(%arg0: i32, %arg1: i32, %arg2: i32) -> (i32, i32, i32, i32) {
    %c0_i32 = arith.constant 0 : i32
    %c0_i32_0 = arith.constant 0 : i32
    return %arg0, %arg2, %arg1, %c0_i32 : i32, i32, i32, i32
  }
}

</mosaic_0001>

<bundles_post_ra>
// kernel: tpu_custom_call.1
= control target key start
LH: loop header
LB: loop body
LE: loop exit
PB: predicated region body
PF: predicated region fallthrough
CT: control target
= control target key end

     0   :  { %s2112_s0 = inlined_call_operand.vmem [shape: f32[2,8,32], index: 0, kind: input, shape index: {}]   ;;  %s2113_s1 = inlined_call_operand.vmem [shape: f32[2,8,32], index: 1, kind: input, shape index: {}]   ;;  %s2114_s2 = inlined_call_operand.vmem [shape: f32[2,8,32], index: 2, kind: input, shape index: {}]   ;;  %s2115_s3 = inlined_call_operand.vmem [shape: f32[4,32,8], index: 3, kind: input, shape index: {}]   ;;  %s2116_s4 = inlined_call_operand.vmem [shape: f32[4,1,8], index: 4, kind: input, shape index: {}]   ;;  %s2117_s5 = inlined_call_operand.vmem [shape: f32[4,32,8], index: 5, kind: input, shape index: {}]   ;;  %s2118_s6 = inlined_call_operand.vmem [shape: f32[4,1,8], index: 6, kind: input, shape index: {}]   ;;  %s2119_s7 = inlined_call_operand.vmem [shape: f32[4,32,8], index: 7, kind: input, shape index: {}]   ;;  %s2120_s8 = inlined_call_operand.vmem [shape: f32[4,1,8], index: 8, kind: input, shape index: {}]   ;;  %s2121_s9 = inlined_call_operand.vmem [shape: f32[4,8,32], index: 9, kind: input, shape index: {}]   ;;  %s2122_s10 = inlined_call_operand.vmem [shape: f32[1,32], index: 10, kind: input, shape index: {}]   ;;  %s2123_s11 = inlined_call_operand.hbm [shape: f32[2,8,32], index: 11, kind: output, shape index: {0}]   ;;  %s2124_s12 = inlined_call_operand.hbm [shape: f32[2,4,8,8], index: 12, kind: output, shape index: {1}]  }
   0x1   :  { %2138 = sst [smem:[#allocation17_spill]] %s2112_s0 }
   0x2   :  { %2139 = sst [smem:[#allocation18_spill]] %s2113_s1 }
   0x3   :  { %2140 = sst [smem:[#allocation19_spill]] %s2114_s2 }
   0x4   :  { %2141 = sst [smem:[#allocation20_spill]] %s2115_s3 }
   0x5   :  { %2142 = sst [smem:[#allocation21_spill]] %s2116_s4 }
   0x6   :  { %2143 = sst [smem:[#allocation22_spill]] %s2117_s5 }
   0x7   :  { %2144 = sst [smem:[#allocation23_spill]] %s2118_s6 }
   0x8   :  { %2145 = sst [smem:[#allocation24_spill]] %s2119_s7 }
   0x9   :  { %2146 = sst [smem:[#allocation25_spill]] %s2121_s9 }
   0xa   :  { %2147 = sst [smem:[#allocation26_spill]] %s2122_s10 }
   0xb   :  { %2148 = sst [smem:[#allocation27_spill]] %s2123_s11 }
   0xc   :  { %2149 = sst [smem:[#allocation28_spill]] %s2124_s12 }
   0xd   :  { %18 = vsyncpa [#allocation4], 0 }
   0xe   :  { %20 = vsyncpa [#allocation4 + $0x1], 0 }
   0xf   :  { %21 = vsyncpa [#allocation6], 0 }
  0x10   :  { %23 = vsyncpa [#allocation6 + $0x1], 0  ;;  %s1805_s21 = smov 0   ;;  %s1807_s22 = smov 0  }
  0x11   :  { %s1809_s23 = smov 0   ;;  %s1811_s24 = smov 0  }
  0x12   :  { %s1813_s25 = smov 0   ;;  %s1815_s26 = smov 0  }
  0x13   :  { %s1817_s27 = smov 0   ;;  %s1819_s28 = smov 0  }
  0x14   :  { %s1821_s29 = smov 0   ;;  %s1823_s30 = smov 0  }
  0x15   :  { %s1825_s13 = smov 0  }
  0x16 LB: > { %2150 = sst [smem:[#allocation9_spill]] %s1705_s24  ;;  %s1371_s14 = sadd.s32 4294967295, %s1733_s13   ;;  %s1733_s13 = sphi %s1825_s13, %s29_s13   ;;  %s1729_s30 = sphi %s1823_s30, %s2188_s30   ;;  %s1725_s29 = sphi %s1821_s29, %s2194_s29   ;;  %s1721_s28 = sphi %s1819_s28, %s2186_s28   ;;  %s1717_s27 = sphi %s1817_s27, %s2185_s27   ;;  %s1713_s26 = sphi %s1815_s26, %s2184_s26   ;;  %s1709_s25 = sphi %s1813_s25, %s2193_s25   ;;  %s1705_s24 = sphi %s1811_s24, %s2192_s24   ;;  %s1701_s23 = sphi %s1809_s23, %s2191_s23   ;;  %s1697_s22 = sphi %s1807_s22, %s2190_s22   ;;  %s1693_s21 = sphi %s1805_s21, %s2189_s21  }
  0x17   : > { %2151 = sst [smem:[#allocation10_spill]] %s1713_s26  ;;  %s1372_s15 = sadd.s32 4294967294, %s1733_s13  }
  0x18   : > { %2152 = sst [smem:[#allocation11_spill]] %s1725_s29  ;;  %s41_s16 = sadd.s32 1, %s1725_s29 }
  0x19   : > { %2153 = sst [smem:[#allocation12_spill]] %s1729_s30  ;;  %s48_s17 = sadd.s32 1, %s1729_s30 }
  0x1a   : > { %p42_p0 = scmp.ge.s32.totalorder %s41_s16, 4  ;;  %s340_s18 = sadd.s32 1, %s1713_s26 }
  0x1b   : > { %p350_p1 = scmp.ne.s32.totalorder %s1713_s26, %s1709_s25  ;;  %p1867_p2 = scmp.eq.s32.totalorder %s1371_s14, 7 }
  0x1c   : > { %s2196_s16 = smov (%p42_p0, %s41_s16), 0  ;;  %s2198_s17 = smov (!%p42_p0, %s48_s17), %s1729_s30 }
  0x1d   : > { %2155 = sst [smem:[#allocation13_spill]] %s2196_s16  ;;  %p1876_p3 = por %p1867_p2, %p350_p1 }
  0x1e   : > { %p356_p4 = scmp.ne.s32.totalorder %s1709_s25, %s1705_s24  ;;  %p50_p5 = scmp.ge.s32.totalorder %s2198_s17, 2 }
  0x1f   : > { %s2156_s20 = scalar_select %p1876_p3, 1, 0 }
  0x20   : > { %p1882_p6 = scmp.eq.s32.totalorder %s1372_s15, 7  ;;  %s364_s12 = ssub.s32 %s1725_s29, %s2196_s16 }
  0x21   : > { %2157 = sst [smem:[#allocation14_spill]] %s2156_s20  ;;  %s370_s11 = sadd.s32 1, %s1701_s23 }
  0x22   : > { %s2200_s17 = smov (%p50_p5, %s2198_s17), 0  ;;  %p1893_p7 = por %p1882_p6, %p356_p4 }
  0x23   : > { %2159 = sst [smem:[#allocation15_spill]] %s2200_s17  ;;  %p380_p8 = scmp.ne.s32.totalorder %s1701_s23, %s1697_s22 }
  0x24   : > { %s2160_s10 = scalar_select %p1893_p7, 1, 0 }
  0x25   : > { %s335_s24 = ssub.s32 %s1729_s30, %s2200_s17  ;;  %p386_p9 = scmp.ne.s32.totalorder %s1697_s22, %s1693_s21 }
  0x26   : > { %p338_p10 = scmp.eq.s32.totalorder %s335_s24, 0  ;;  %s365_s15 = sor.u32 %s364_s12, %s335_s24 }
  0x27   : > { %p368_p11 = scmp.eq.s32.totalorder %s365_s15, 0  ;;  %p1905_p12 = por %p380_p8, %p1867_p2 }
  0x28   : > { %s1910_s16 = scalar_select %p338_p10, %s1713_s26, %s340_s18  }
  0x29   : > { %s1913_s29 = scalar_select %p368_p11, %s1701_s23, %s370_s11  }
  0x2a   : > { %2162 = sst [smem:[#allocation16_spill]] %s1910_s16  ;;  %p1917_p13 = por %p386_p9, %p1882_p6 }
  0x2b   : > { %p1375_p0 = scmp.ge.s32.totalorder %s1733_s13, 1  ;;  %p481_p1 = scmp.lt.s32.totalorder %s1733_s13, 9 }
  0x2c   : > { %s2163_s9 = scalar_select %p1917_p13, 1, 0 }
  0x2d   : > { %p482_p4 = pnand %p1375_p0, %p481_p1 }
  0x2e   : > { %p581_p2 = scmp.lt.s32.totalorder (!%p482_p4), %s1717_s27, 3  ;;  %s2132_s12 = sand.u32 (!%p482_p4), 1, %s1709_s25  }
  0x2f   : > { %485 = sbr.rel (%p482_p4) target bundleno = 1231 (0x4cf), region = 64  ;;  %s1928_s11 = sshll.u32 (!%p482_p4), %s2132_s12, 3 }
  0x30   : > { %p566_p5 = scmp.lt.s32.totalorder (!%p482_p4), %s1721_s28, 1  ;;  %s2164_s5 = sld [smem:[#allocation22_spill]] (!%p482_p4) }
  0x31   : > { %s2165_s3 = sld [smem:[#allocation20_spill]] (!%p482_p4)  ;;  %p1398_p6 = scmp.ne.s32.totalorder (!%p482_p4), %s1717_s27, 0 }
  0x32   : > { %s2166_s1 = sld [smem:[#allocation18_spill]] (!%p482_p4) }
  0x33   : > { %s2167_s0 = sld [smem:[#allocation17_spill]] (!%p482_p4) }
  0x34   : > { %v1735_v0 = vmov 0.0   ;;  %s1933_s24 = scalar_select %p581_p2, %s1717_s27, 3  ;;  %vm1736_vm0 = vmmov 0   ;;  %vm632_vm1 = vcmask 261120   ;;  %vm866_vm2 = vcmask 64512  }
  0x35   : > { %1443 = vmatprep.subr.mxu1 %v1735_v0  ;;  %1432 = vmatprep.subr.mxu0 %v1735_v0  ;;  %s567_s16 = scalar_select %p566_p5, %s1721_s28, 1 }
  0x36   : > { %1451 = vmatprep.mubr.msk.f32.mxu1 %vm1736_vm0, %v1735_v0  ;;  %1440 = vmatprep.mubr.msk.f32.mxu0 %vm1736_vm0, %v1735_v0  ;;  %s1940_s18 = sshll.u32 %s1933_s24, 5  ;;  %s2168_s6 = sld [smem:[#allocation23_spill]] }
  0x37   : > { %s593_s15 = scalar_lea.vmem %s2164_s5, %s1940_s18  ;;  %s585_s30 = scalar_lea.vmem %s2165_s3, %s1940_s18 }
  0x38   : > { %v619_v1 = vld [vmem:[%s593_s15 + $0x18] sm:$0xff]  ;;  %v618_v3 = vld [vmem:[%s593_s15 + $0x10] sm:$0xff]  ;;  %v617_v5 = vld [vmem:[%s593_s15 + $0x8] sm:$0xff]  ;;  %s1953_s19 = sshll.u32 %s567_s16, 3  ;;  %s2169_s4 = sld [smem:[#allocation21_spill]] }
  0x39   : > { %v615_v2 = vld [vmem:[%s585_s30 + $0x18] sm:$0xff]  ;;  %1444 = vmatpush3.msra.mxu1 %v619_v1  ;;  %v614_v4 = vld [vmem:[%s585_s30 + $0x10] sm:$0xff]  ;;  %v613_v6 = vld [vmem:[%s585_s30 + $0x8] sm:$0xff]  ;;  %s576_s14 = scalar_lea.vmem %s2166_s1, %s1953_s19  ;;  %s572_s26 = scalar_lea.vmem %s2167_s0, %s1953_s19 }
  0x3a   : > { %1433 = vmatpush3.msra.mxu0 %v615_v2  ;;  %1445 = vmatprep.subr.mxu1 %v1735_v0  ;;  %v616_v7 = vld [vmem:[%s593_s15] sm:$0xff]  ;;  %s2170_s7 = sld [smem:[#allocation24_spill]]  ;;  %s1387_s16 = sshll.u32 %s1933_s24, 3 }
  0x3b   : > { %1434 = vmatprep.subr.mxu0 %v1735_v0  ;;  %1446 = vmatpush3.msra.mxu1 %v618_v3  ;;  %v612_v8 = vld [vmem:[%s585_s30] sm:$0xff]  ;;  %s2171_s2 = sld [smem:[#allocation19_spill]]  ;;  %s604_s30 = scalar_lea.vmem %s2120_s8, %s1933_s24 }
  0x3c   : > { %1435 = vmatpush3.msra.mxu0 %v614_v4  ;;  %1447 = vmatprep.subr.mxu1 %v1735_v0  ;;  %v610_v9 = vld [vmem:[%s576_s14] sm:$0xff]  ;;  %s2172_s12 = sld [smem:[#allocation25_spill]]  ;;  %s2136_s3 = sand.u32 1, %s1697_s22  }
  0x3d   : > { %1436 = vmatprep.subr.mxu0 %v1735_v0  ;;  %1448 = vmatpush3.msra.mxu1 %v617_v5  ;;  %v609_v10 = vld [vmem:[%s572_s26] sm:$0xff]  ;;  %s596_s26 = scalar_lea.vmem %s2168_s6, %s1933_s24  ;;  %s2016_s5 = sshll.u32 %s2136_s3, 3 }
  0x3e   : > { %1437 = vmatpush3.msra.mxu0 %v613_v6  ;;  %1449 = vmatprep.subr.mxu1 %v1735_v0  ;;  %s588_s15 = scalar_lea.vmem %s2169_s4, %s1933_s24  ;;  %v1390_v11 = vld [vmem:[%s596_s26] ss:$0 sm:$0xff]  ;;  %s558_s24 = scalar_lea.vmem [#allocation3], %s1928_s11 }
  0x3f   : > { %1438 = vmatprep.subr.mxu0 %v1735_v0  ;;  %1450 = vmatpush3.msra.mxu1 %v616_v7  ;;  %v1388_v12 = vld [vmem:[%s588_s15] ss:$0 sm:$0xff] }
  0x40   : > { %1439 = vmatpush3.msra.mxu0 %v612_v8  ;;  %1452 = vmatmul.mubr.msk.f32.vlgmr.msra.gmra.mxu1 %vm632_vm1, %v610_v9  ;;  %s601_s14 = scalar_lea.vmem %s2170_s7, %s1940_s18  ;;  %v1392_v34 = vld [vmem:[%s604_s30] ss:$0 sm:$0xff] }
  0x41   : > { %1441 = vmatmul.mubr.msk.f32.vlgmr.msra.gmra.mxu0 %vm632_vm1, %v609_v10  ;;  %1465 = vmatprep.subr.mxu1 %v1735_v0  ;;  %v623_v19 = vld [vmem:[%s601_s14 + $0x18] sm:$0xff]  ;;  %v622_v20 = vld [vmem:[%s601_s14 + $0x10] sm:$0xff]  ;;  %v621_v21 = vld [vmem:[%s601_s14 + $0x8] sm:$0xff]  ;;  %s580_s26 = scalar_lea.vmem %s2171_s2, %s1953_s19 }
  0x42   : > { %1467 = vmatprep.mubr.msk.f32.mxu1 %vm1736_vm0, %v1735_v0  ;;  %1454 = vmatprep.subr.mxu0 %v1735_v0  ;;  %v620_v22 = vld [vmem:[%s601_s14] sm:$0xff]  ;;  %s608_s14 = scalar_lea.vmem %s2172_s12, %s1387_s16 }
  0x43   : > { %1462 = vmatprep.mubr.msk.f32.mxu0 %vm1736_vm0, %v1735_v0  ;;  %1455 = vmatpush3.msra.mxu0 %v623_v19  ;;  %v611_v23 = vld [vmem:[%s580_s26] sm:$0xff]  ;;  %s2137_s26 = scalar_lea.vmem [#allocation5], %s2016_s5 }
  0x44   : > { %1456 = vmatprep.subr.mxu0 %v1735_v0  ;;  %v624_v37 = vld [vmem:[%s608_s14] sm:$0xff] }
  0x45   : > { %1457 = vmatpush3.msra.mxu0 %v622_v20 }
  0x46   : > { %1458 = vmatprep.subr.mxu0 %v1735_v0 }
  0x47   : > { %1459 = vmatpush3.msra.mxu0 %v621_v21 }
  0x48   : > { %1460 = vmatprep.subr.mxu0 %v1735_v0 }
  0x49   : > { %1461 = vmatpush3.msra.mxu0 %v620_v22 }
  0x4a   : > { %1463 = vmatmul.mubr.msk.f32.vlgmr.msra.gmra.mxu0 %vm632_vm1, %v611_v23  ;;  %1475 = vmatprep.subr.mxu0 %v1735_v0 }
  0x4b   : > { %1477 = vmatprep.mubr.msk.f32.mxu0 %vm1736_vm0, %v1735_v0  ;;  %1476 = vmatpush3.msra.mxu0 %v624_v37 }
 0x100   : > { %v782_v13 = vpop.f32.mrf.mxu1 }
 0x101   : > { %v702_v14 = vpop.f32.mrf.mxu0  ;;  %v783_v15 = vadd.f32 %v1390_v11, %v782_v13 }
 0x102   : > { %v703_v16 = vadd.f32 %v1388_v12, %v702_v14  ;;  %v1453_v17 = vpop.f32.mrf.mxu1 }
 0x103   : > { %v1442_v18 = vpop.f32.mrf.mxu0  ;;  %1466 = vmatpush3.xpose.msk.msra.mxu1 %vm866_vm2, %v783_v15 }
 0x104   : > { %1470 = vmatprep.subr.mxu1 %v1735_v0 }
 0x106   : > { %1468 = vmatmul.mubr.msk.f32.vlgmr.msra.gmra.mxu1 %vm866_vm2, %v703_v16 }
 0x107   : > { %1472 = vmatprep.mubr.msk.f32.mxu1 %vm1736_vm0, %v1735_v0 }
 0x10a   : > { %v862_v33 = vpop.f32.mrf.mxu0 }
 0x10b   : > { %v863_v35 = vadd.f32 %v1392_v34, %v862_v33 }
 0x10c   : > { %v1464_v36 = vpop.f32.mrf.mxu0 }
 0x10d   : > { %1471 = vmatpush3.msra.mxu1 %v863_v35 }
 0x1c6   : > { %v939_v24 = vpop.f32.mrf.mxu1 }
 0x1c7   : > { %v943_v25 = vmul.f32 0.35355338, %v939_v24 }
 0x1c8   : > { %v1469_v26 = vpop.f32.mrf.mxu1 }
 0x1c9   : > { %v944_v27 = vsel %vm866_vm2, %v943_v25, -inf }
 0x1ca   : > { %945 = vmax.xlane.f32.xlu0 %v944_v27 }
 0x253   : > { %v946_v28 = vpop.xlane.xlu0 %945 }
 0x254   : > { %v947_v29 = vsub.f32 %v943_v25, %v946_v28 }
 0x256   : > { %v948_v30 = vmul.f32 1.442695, %v947_v29 }
 0x258   : > { %1583 = vpow2.f32 %v948_v30 }
 0x265   : > { %v1584_v31 = vpop.eup %1583 }
 0x266   : > { %v950_v32 = vsel %vm866_vm2, %v1584_v31, 0.0 }
 0x267   : > { %951 = vadd.xlane.f32.xlu0 %v950_v32 }
 0x2f0   : > { %v952_v38 = vpop.xlane.xlu0 %951 }
 0x2f1   : > { %1585 = vrcp.f32 %v952_v38 }
 0x2fe   : > { %v1586_v39 = vpop.eup %1585 }
 0x2ff   : > { %v954_v40 = vmul.f32 %v1586_v39, %v1584_v31 }
 0x301   : > { %955 = vst.msk [vmem:[%s2137_s26] sm:$0xff] %vm866_vm2, %v954_v40  ;;  %1473 = vmatmul.mubr.msk.f32.vlgmr.msra.gmra.mxu1 %vm866_vm2, %v954_v40 }
 0x3c1   : > { %v1025_v41 = vpop.f32.mrf.mxu1 }
 0x3c2   : > { %1478 = vmatmul.mubr.msk.f32.vlgmr.msra.gmra.mxu0 %vm866_vm2, %v1025_v41 }
 0x3c3   : > { %v1474_v42 = vpop.f32.mrf.mxu1 }
 0x480   : > { %1105 = sbr.rel (%p1398_p6) target bundleno = 1159 (0x487), region = 68 }
 0x482   : > { %v1098_v43 = vpop.f32.mrf.mxu0 }
 0x484   : > { %v1479_v44 = vpop.f32.mrf.mxu0 }
 0x485   : > { %v1737_v45 = vmov 0.0  }
 0x486   : > { %1106 = vst.msk [vmem:[#allocation2] sm:$0xff] %vm632_vm1, %v1737_v45 }
 0x487 PF: > { %p1399_p8 = scmp.ne.s32.totalorder %s1717_s27, 3 }
 0x488   : > { %s2173_s30 = sld [smem:[#allocation26_spill]] (!%p1399_p8) }
 0x48c   : > { %1113 = sbr.rel (%p1399_p8) target bundleno = 1179 (0x49b), region = 72 }
 0x48d   : > { %v1107_v46 = vld [vmem:[#allocation2] sm:$0xff] }
 0x48e   : > { %v1108_v47 = vadd.f32 %v1107_v46, %v1098_v43 }
 0x490   : > { %1109 = vst.msk [vmem:[#allocation2] sm:$0xff] %vm632_vm1, %v1108_v47 }
 0x491   : > { %v1400_v49 = vld [vmem:[%s2173_s30] ss:$0 sm:$0xff] }
 0x497   : > { %v1114_v48 = vld [vmem:[#allocation2] sm:$0xff] }
 0x498   : > { %v1122_v50 = vadd.f32 %v1400_v49, %v1114_v48 }
 0x49a   : > { %1123 = vst.msk [vmem:[%s558_s24] sm:$0xff] %vm632_vm1, %v1122_v50 }
 0x49b PF: > { %s1403_s16 = sshll.u32 %s1721_s28, 7  ;;  %s2175_s12 = sld [smem:[#allocation27_spill]] }
 0x49c   : > { %s1144_s3 = sshll.u32 %s558_s24, 4  ;;  %s2176_s26 = sand.u32 1, %s1709_s25   ;;  %s1145_s3 = int_to_ptr.vmem [resolvable:$true] %s1144_s3 }
 0x49d   : > { %s1125_s0 = scalar_lea.sflag [#allocation4], %s2176_s26  ;;  %s1587_s1 = scalar_lea.vmem %s1145_s3, 128 }
 0x49e   : > { %p1588_p9 = scmp.ne.s32.totalorder %s1145_s3, %s1587_s1  ;;  %s1738_s18 = smov [#allocation3]  }
 0x49f   : > { %s1591_s19 = sshll.u32 %s1738_s18, 4  ;;  %s1592_s19 = int_to_ptr.vmem [resolvable:$false] %s1591_s19 }
 0x4a0   : > { %p1589_p10 = pnand %p1588_p9, %p1876_p3  ;;  %s1593_s30 = scalar_lea.vmem %s1592_s19, 256 }
 0x4a1   : > { %s1142_s14 = scalar_lea.hbm %s2175_s12, %s1403_s16  ;;  %p1594_p0 = scmp.lt.s32.totalorder %s1145_s3, %s1592_s19 }
 0x4a2   : > { %p1590_p11 = pneg %p1589_p10  ;;  %p1595_p1 = scmp.lt.s32.totalorder %s1593_s30, %s1587_s1 }
 0x4a4   : > { %p1596_p4 = por %p1595_p1, %p1594_p0 }
 0x4a6   : > { %p1597_p2 = pnand %p1596_p4, %p1590_p11 }
 0x4a8   : > { %1600 = shalt.err (!%p1597_p2)
}
 0x4a9   : > { %s1601_s15 = scalar_lea.hbm %s1142_s14, 128  ;;  %s1605_s16 = scalar_lea.hbm %s2175_s12, 256 }
 0x4aa   : > { %p1602_p5 = scmp.ne.s32.totalorder %s1142_s14, %s1601_s15  ;;  %p1606_p9 = scmp.lt.s32.totalorder %s1142_s14, %s2175_s12 }
 0x4ab   : > { %p1607_p10 = scmp.lt.s32.totalorder %s1605_s16, %s1601_s15 }
 0x4ac   : > { %p1603_p6 = pnand %p1602_p5, %p1876_p3 }
 0x4ad   : > { %p1608_p13 = por %p1607_p10, %p1606_p9 }
 0x4ae   : > { %p1604_p8 = pneg %p1603_p6 }
 0x4b0   : > { %p1609_p7 = pnand %p1608_p13, %p1604_p8 }
 0x4b2   : > { %1612 = shalt.err (!%p1609_p7)
}
 0x4b3   : > { %1480 = dma.vmem_to_hbm [thread:$0]  (%p1876_p3), %s1145_s3, 128, %s1142_s14, %s1125_s0  }
 0x4b4   : > { %s1404_s1 = sshll.u32 %s1721_s28, 2  ;;  %s2177_s18 = scalar_lea.vmem [#allocation5], %s2016_s5 }
 0x4b5   : > { %s1160_s19 = sshll.u32 %s2177_s18, 4  ;;  %s1156_s30 = sadd.s32 %s1717_s27, %s1404_s1  ;;  %s1161_s19 = int_to_ptr.vmem [resolvable:$true] %s1160_s19 }
 0x4b6   : > { %s1405_s26 = sshll.u32 %s1156_s30, 7  ;;  %s2178_s15 = sld [smem:[#allocation28_spill]] }
 0x4b7   : > { %s2179_s17 = sand.u32 1, %s1697_s22   ;;  %s1613_s6 = scalar_lea.vmem %s1161_s19, 128 }
 0x4b8   : > { %s1130_s4 = scalar_lea.sflag [#allocation6], %s2179_s17  ;;  %p1614_p7 = scmp.ne.s32.totalorder %s1161_s19, %s1613_s6 }
 0x4b9   : > { %s1739_s11 = smov [#allocation5]  }
 0x4ba   : > { %p1615_p13 = pnand %p1614_p7, %p1905_p12  ;;  %s1617_s7 = sshll.u32 %s1739_s11, 4  ;;  %s1618_s7 = int_to_ptr.vmem [resolvable:$false] %s1617_s7 }
 0x4bb   : > { %s1619_s0 = scalar_lea.vmem %s1618_s7, 256  ;;  %p1620_p3 = scmp.lt.s32.totalorder %s1161_s19, %s1618_s7 }
 0x4bc   : > { %s1158_s16 = scalar_lea.hbm %s2178_s15, %s1405_s26  ;;  %p1616_p11 = pneg %p1615_p13 }
 0x4bd   : > { %p1621_p0 = scmp.lt.s32.totalorder %s1619_s0, %s1613_s6 }
 0x4bf   : > { %p1622_p1 = por %p1621_p0, %p1620_p3 }
 0x4c1   : > { %p1623_p4 = pnand %p1622_p1, %p1616_p11 }
 0x4c3   : > { %1626 = shalt.err (!%p1623_p4)
}
 0x4c4   : > { %s1627_s27 = scalar_lea.hbm %s1158_s16, 128  ;;  %s1631_s5 = scalar_lea.hbm %s2178_s15, 1024 }
 0x4c5   : > { %p1628_p2 = scmp.ne.s32.totalorder %s1158_s16, %s1627_s27  ;;  %p1632_p8 = scmp.lt.s32.totalorder %s1158_s16, %s2178_s15 }
 0x4c6   : > { %p1633_p9 = scmp.lt.s32.totalorder %s1631_s5, %s1627_s27 }
 0x4c7   : > { %p1629_p5 = pnand %p1628_p2, %p1905_p12 }
 0x4c8   : > { %p1634_p10 = por %p1633_p9, %p1632_p8 }
 0x4c9   : > { %p1630_p6 = pneg %p1629_p5 }
 0x4cb   : > { %p1635_p7 = pnand %p1634_p10, %p1630_p6 }
 0x4cd   : > { %1638 = shalt.err (!%p1635_p7)
}
 0x4ce   : > { %1481 = dma.vmem_to_hbm [thread:$0]  (%p1905_p12), %s1161_s19, 128, %s1158_s16, %s1130_s4  }
 0x4cf PF: > { %s2180_s6 = sld [smem:[#allocation9_spill]]  ;;  %p1491_p13 = scmp.ge.s32.totalorder %s1733_s13, 2 }
 0x4d0   : > { %p2181_p11 = scmp.ne.s32.totalorder %s2160_s10, 0 }
 0x4d2   : > { %p1485_p3 = pnand %p1491_p13, %p2181_p11 }
 0x4d4   : > { %p1486_p0 = pneg %p1485_p3 }
 0x4d5   : > { %s1172_s7 = sand.u32 1, %s2180_s6  }
 0x4d6   : > { %s1173_s18 = scalar_lea.sflag [#allocation4], %s1172_s7 }
 0x4d7   : > { %1684 = dma.done.wait (%p1486_p0), %s1173_s18, 128  }
 0x4d8   : > { %1686 = vsyncadd (%p1486_p0), %s1173_s18, 4294967168  ;;  %s1181_s30 = sand.u32 1, %s1693_s21   ;;  %p2182_p1 = scmp.ne.s32.totalorder %s2163_s9, 0 }
 0x4d9   : > { %s1182_s20 = scalar_lea.sflag [#allocation6], %s1181_s30 }
 0x4da   : > { %p1488_p4 = pnand %p1491_p13, %p2182_p1 }
 0x4dc   : > { %p1489_p2 = pneg %p1488_p4 }
 0x4de   : > { %1688 = dma.done.wait (%p1489_p2), %s1182_s20, 128  }
 0x4df   : > { %1690 = vsyncadd (%p1489_p2), %s1182_s20, 4294967168  ;;  %s29_s13 = sadd.s32 1, %s1733_s13   ;;  %s2183_s4 = sld [smem:[#allocation10_spill]] }
 0x4e0   : > { %p26_p12 = scmp.ge.s32.totalorder %s29_s13, 10   ;;  %s2184_s26 = sld [smem:[#allocation16_spill]] }
 0x4e1   : > { %s2185_s27 = sld [smem:[#allocation11_spill]]  ;;  %s2189_s21 = smov %s1697_s22 }
 0x4e2   : > { %s2186_s28 = sld [smem:[#allocation12_spill]]  ;;  %s2190_s22 = smov %s1701_s23 }
 0x4e3   : > { %s2187_s10 = sld [smem:[#allocation13_spill]]  ;;  %s2191_s23 = smov %s1913_s29 }
 0x4e4   : > { %s2188_s30 = sld [smem:[#allocation15_spill]]  ;;  %s2192_s24 = smov %s1709_s25 }
 0x4e5   : > { %s2193_s25 = smov %s2183_s4  ;;  %28 = sbr.rel (!%p26_p12) target bundleno = 22 (0x16), region = 151 }
 0x4e9   : > { %s2194_s29 = smov %s2187_s10 }
 0x4ea   :  { %1187 = vsyncpa [#allocation4], 1 }
 0x4eb   :  { %1189 = vsyncpa [#allocation4 + $0x1], 1 }
 0x4ec   :  { %1190 = vsyncpa [#allocation6], 1 }
 0x4ed   :  { %1192 = vsyncpa [#allocation6 + $0x1], 1 }

</bundles_post_ra>
